<compile_context>
chip_gen: v5e
topology: v5e:2x2
jax: 0.10.0
libtpu: 0.0.40
codegen_flags: <defaults>
</compile_context>

<pallas_src>
import functools

import jax
import jax.numpy as jnp
from jax.experimental import pallas as pl
from jax.experimental.pallas import tpu as pltpu

LANE = 128      # vreg lane width
SUBLANE = 8     # vreg sublane width


def encoder_kernel(x_ref, w1_ref, b1_ref, w2_ref, b2_ref, w3_ref, b3_ref,
                   out_ref):
    """Fused 3-layer MLP encoder on one batch tile.

    x_ref: (TB, n_input) bf16          w*_ref: (in, out) bf16 (resident)
    b*_ref: (1, out) f32 (resident)    out_ref: (TB, n_out_pad) f32
    """
    x = x_ref[...]

    # fc1_hidden + ReLU (bf16 MXU inputs, f32 accumulate)
    h1 = jnp.dot(x, w1_ref[...], preferred_element_type=jnp.float32)
    h1 = jnp.maximum(h1 + b1_ref[...], 0.0)

    # fc2_hidden + ReLU
    h2 = jnp.dot(h1.astype(w2_ref.dtype), w2_ref[...],
                 preferred_element_type=jnp.float32)
    h2 = jnp.maximum(h2 + b2_ref[...], 0.0)

    # fc2_botlneck (no activation); output feature dim is lane-padded to 128
    out = jnp.dot(h2.astype(w3_ref.dtype), w3_ref[...],
                  preferred_element_type=jnp.float32)
    out_ref[...] = (out + b3_ref[...]).astype(out_ref.dtype)


def encoder_forward(x, w1, b1, w2, b2, w3, b3, *, block_batch=1024):
    """x: [B, n_input] f32; w_i: [in, out] f32; b_i: [1, out] f32.

    Returns [B, n_bottleneck] f32.
    """
    B, n_input = x.shape
    n_hidden = w1.shape[1]
    n_bottleneck = w3.shape[1]

    # Pad the output feature dim up to a lane-dense multiple of 128.
    n_out_pad = max(LANE, pl.cdiv(n_bottleneck, LANE) * LANE)

    # Batch tile: multiple of the sublane width, capped by block_batch.
    tb = min(block_batch, pl.cdiv(B, SUBLANE) * SUBLANE)
    tb = max(tb, SUBLANE)
    b_pad = pl.cdiv(B, tb) * tb

    # bf16 inputs/weights; zero-pad batch and output-feature dims.
    x_bf = x.astype(jnp.bfloat16)
    if b_pad != B:
        x_bf = jnp.pad(x_bf, ((0, b_pad - B), (0, 0)))
    w1_bf = w1.astype(jnp.bfloat16)
    w2_bf = w2.astype(jnp.bfloat16)
    w3_bf = jnp.pad(w3, ((0, 0), (0, n_out_pad - n_bottleneck))
                    ).astype(jnp.bfloat16)
    b3_p = jnp.pad(b3, ((0, 0), (0, n_out_pad - n_bottleneck)))

    grid = (b_pad // tb,)
    resident = lambda i: (0, 0)   # weights/biases stay in VMEM across steps

    flops = 2 * b_pad * (n_input * n_hidden
                         + n_hidden * n_hidden
                         + n_hidden * n_out_pad)
    bytes_accessed = (x_bf.size * 2
                      + (w1_bf.size + w2_bf.size + w3_bf.size) * 2
                      + (b1.size + b2.size + b3_p.size) * 4
                      + b_pad * n_out_pad * 4)
    cost = pl.CostEstimate(flops=flops, transcendentals=0,
                           bytes_accessed=bytes_accessed)

    out = pl.pallas_call(
        encoder_kernel,
        out_shape=jax.ShapeDtypeStruct((b_pad, n_out_pad), jnp.float32),
        grid=grid,
        in_specs=[
            pl.BlockSpec((tb, n_input), lambda i: (i, 0)),        # x tile
            pl.BlockSpec((n_input, n_hidden), resident),          # w1
            pl.BlockSpec((1, n_hidden), resident),                # b1
            pl.BlockSpec((n_hidden, n_hidden), resident),         # w2
            pl.BlockSpec((1, n_hidden), resident),                # b2
            pl.BlockSpec((n_hidden, n_out_pad), resident),        # w3 (padded)
            pl.BlockSpec((1, n_out_pad), resident),               # b3 (padded)
        ],
        out_specs=pl.BlockSpec((tb, n_out_pad), lambda i: (i, 0)),
        compiler_params=pltpu.CompilerParams(
            dimension_semantics=("parallel",),
        ),
        cost_estimate=cost,
    )(x_bf, w1_bf, b1, w2_bf, b2, w3_bf, b3_p)

    return out[:B, :n_bottleneck]


def init_linear_params(key, n_in, n_out):
    """PyTorch nn.Linear default init: uniform(-1/sqrt(n_in), 1/sqrt(n_in)).
    Weight returned as [n_in, n_out] (transposed vs PyTorch's [n_out, n_in])."""
    kw, kb = jax.random.split(key)
    bound = 1.0 / jnp.sqrt(jnp.float32(n_in))
    w = jax.random.uniform(kw, (n_in, n_out), jnp.float32, -bound, bound)
    b = jax.random.uniform(kb, (1, n_out), jnp.float32, -bound, bound)
    return w, b


def _ref_bf16(x, w1, b1, w2, b2, w3, b3):
    """Pure-JAX reference mirroring the kernel's bf16-in / f32-accum numerics."""
    bf = jnp.bfloat16
    h1 = jnp.maximum(
        jnp.dot(x.astype(bf), w1.astype(bf),
                preferred_element_type=jnp.float32) + b1, 0.0)
    h2 = jnp.maximum(
        jnp.dot(h1.astype(bf), w2.astype(bf),
                preferred_element_type=jnp.float32) + b2, 0.0)
    return jnp.dot(h2.astype(bf), w3.astype(bf),
                   preferred_element_type=jnp.float32) + b3


if __name__ == "__main__":
    # Small shapes consistent with the module's forward: [batch, n_input].
    batch, n_input, n_hidden, n_bottleneck = 20, 32, 64, 16

    key = jax.random.PRNGKey(0)
    k_x, k1, k2, k3 = jax.random.split(key, 4)

    x = jax.random.normal(k_x, (batch, n_input), jnp.float32)
    w1, b1 = init_linear_params(k1, n_input, n_hidden)
    w2, b2 = init_linear_params(k2, n_hidden, n_hidden)
    w3, b3 = init_linear_params(k3, n_hidden, n_bottleneck)

    # Small block_batch so the test exercises a multi-step grid + batch padding.
    encoded = encoder_forward(x, w1, b1, w2, b2, w3, b3, block_batch=8)
    encoded = jax.block_until_ready(encoded)
    assert encoded.shape == (batch, n_bottleneck)

    # Check against a bf16-consistent reference (tight) ...
    ref_bf = _ref_bf16(x, w1, b1, w2, b2, w3, b3)
    assert jnp.allclose(encoded, ref_bf, atol=2e-3, rtol=2e-3)

    # ... and against the full-f32 PyTorch-equivalent forward (loose, bf16 inputs).
    ref_f32 = jnp.maximum(x @ w1 + b1, 0.0)
    ref_f32 = jnp.maximum(ref_f32 @ w2 + b2, 0.0)
    ref_f32 = ref_f32 @ w3 + b3
    assert jnp.allclose(encoded, ref_f32, atol=1e-1, rtol=1e-1)

    print("KERNEL_OK")
</pallas_src>

<mosaic_0001>
module attributes {stable_mosaic.version = 11 : i64} {
  func.func @encoder_kernel(%arg0: i32, %arg1: memref<8x32xbf16, #tpu.memory_space<vmem>>, %arg2: memref<32x64xbf16, #tpu.memory_space<vmem>>, %arg3: memref<1x64xf32, #tpu.memory_space<vmem>>, %arg4: memref<64x64xbf16, #tpu.memory_space<vmem>>, %arg5: memref<1x64xf32, #tpu.memory_space<vmem>>, %arg6: memref<64x128xbf16, #tpu.memory_space<vmem>>, %arg7: memref<1x128xf32, #tpu.memory_space<vmem>>, %arg8: memref<8x128xf32, #tpu.memory_space<vmem>>) attributes {dimension_semantics = [#tpu.dimension_semantics<parallel>], iteration_bounds = array<i64: 3>, scalar_prefetch = 0 : i64, scratch_operands = 0 : i64, tpu.core_type = #tpu.core_type<tc>, window_params = [{transform_indices = @transform_0, window_bounds = array<i64: 8, 32>}, {pipeline_mode = #tpu.pipeline_mode<synchronous>, transform_indices = @transform_1, window_bounds = array<i64: 32, 64>}, {pipeline_mode = #tpu.pipeline_mode<synchronous>, transform_indices = @transform_2, window_bounds = array<i64: 1, 64>}, {pipeline_mode = #tpu.pipeline_mode<synchronous>, transform_indices = @transform_3, window_bounds = array<i64: 64, 64>}, {pipeline_mode = #tpu.pipeline_mode<synchronous>, transform_indices = @transform_4, window_bounds = array<i64: 1, 64>}, {pipeline_mode = #tpu.pipeline_mode<synchronous>, transform_indices = @transform_5, window_bounds = array<i64: 64, 128>}, {pipeline_mode = #tpu.pipeline_mode<synchronous>, transform_indices = @transform_6, window_bounds = array<i64: 1, 128>}, {transform_indices = @transform_7, window_bounds = array<i64: 8, 128>}]} {
    %c0 = arith.constant 0 : index
    %c0_0 = arith.constant 0 : index
    %0 = vector.load %arg1[%c0, %c0_0] : memref<8x32xbf16, #tpu.memory_space<vmem>>, vector<8x32xbf16>
    %c0_1 = arith.constant 0 : index
    %c0_2 = arith.constant 0 : index
    %1 = vector.load %arg2[%c0_1, %c0_2] : memref<32x64xbf16, #tpu.memory_space<vmem>>, vector<32x64xbf16>
    %cst = arith.constant dense<0.000000e+00> : vector<8x64xf32>
    %2 = tpu.matmul %0, %1, %cst {dimension_numbers = #tpu.dot_dimension_numbers<[1], [0], [0], [1], [0, 0, 1, 1], [], []>} : vector<8x32xbf16>, vector<32x64xbf16>, vector<8x64xf32> -> vector<8x64xf32>
    %c0_3 = arith.constant 0 : index
    %c0_4 = arith.constant 0 : index
    %3 = vector.load %arg3[%c0_3, %c0_4] : memref<1x64xf32, #tpu.memory_space<vmem>>, vector<1x64xf32>
    %4 = vector.broadcast %3 : vector<1x64xf32> to vector<8x64xf32>
    %5 = arith.addf %2, %4 : vector<8x64xf32>
    %cst_5 = arith.constant 0.000000e+00 : f32
    %6 = vector.broadcast %cst_5 : f32 to vector<8x64xf32>
    %7 = arith.maximumf %5, %6 : vector<8x64xf32>
    %8 = arith.truncf %7 : vector<8x64xf32> to vector<8x64xbf16>
    %c0_6 = arith.constant 0 : index
    %c0_7 = arith.constant 0 : index
    %9 = vector.load %arg4[%c0_6, %c0_7] : memref<64x64xbf16, #tpu.memory_space<vmem>>, vector<64x64xbf16>
    %cst_8 = arith.constant dense<0.000000e+00> : vector<8x64xf32>
    %10 = tpu.matmul %8, %9, %cst_8 {dimension_numbers = #tpu.dot_dimension_numbers<[1], [0], [0], [1], [0, 0, 1, 1], [], []>} : vector<8x64xbf16>, vector<64x64xbf16>, vector<8x64xf32> -> vector<8x64xf32>
    %c0_9 = arith.constant 0 : index
    %c0_10 = arith.constant 0 : index
    %11 = vector.load %arg5[%c0_9, %c0_10] : memref<1x64xf32, #tpu.memory_space<vmem>>, vector<1x64xf32>
    %12 = vector.broadcast %11 : vector<1x64xf32> to vector<8x64xf32>
    %13 = arith.addf %10, %12 : vector<8x64xf32>
    %cst_11 = arith.constant 0.000000e+00 : f32
    %14 = vector.broadcast %cst_11 : f32 to vector<8x64xf32>
    %15 = arith.maximumf %13, %14 : vector<8x64xf32>
    %16 = arith.truncf %15 : vector<8x64xf32> to vector<8x64xbf16>
    %c0_12 = arith.constant 0 : index
    %c0_13 = arith.constant 0 : index
    %17 = vector.load %arg6[%c0_12, %c0_13] : memref<64x128xbf16, #tpu.memory_space<vmem>>, vector<64x128xbf16>
    %cst_14 = arith.constant dense<0.000000e+00> : vector<8x128xf32>
    %18 = tpu.matmul %16, %17, %cst_14 {dimension_numbers = #tpu.dot_dimension_numbers<[1], [0], [0], [1], [0, 0, 1, 1], [], []>} : vector<8x64xbf16>, vector<64x128xbf16>, vector<8x128xf32> -> vector<8x128xf32>
    %c0_15 = arith.constant 0 : index
    %c0_16 = arith.constant 0 : index
    %19 = vector.load %arg7[%c0_15, %c0_16] : memref<1x128xf32, #tpu.memory_space<vmem>>, vector<1x128xf32>
    %20 = vector.broadcast %19 : vector<1x128xf32> to vector<8x128xf32>
    %21 = arith.addf %18, %20 : vector<8x128xf32>
    %c0_17 = arith.constant 0 : index
    %c0_18 = arith.constant 0 : index
    %22 = vector.load %arg8[%c0_17, %c0_18] : memref<8x128xf32, #tpu.memory_space<vmem>>, vector<8x128xf32>
    tpu.vector_store %arg8[%c0_17, %c0_18], %21 {strides = array<i32>} : memref<8x128xf32, #tpu.memory_space<vmem>>, vector<8x128xf32>,
    return
  }
  func.func @transform_0(%arg0: i32) -> (i32, i32) {
    %c0_i32 = arith.constant 0 : i32
    %c0_i32_0 = arith.constant 0 : i32
    return %arg0, %c0_i32 : i32, i32
  }
  func.func @transform_1(%arg0: i32) -> (i32, i32) {
    %c0_i32 = arith.constant 0 : i32
    %c0_i32_0 = arith.constant 0 : i32
    %c0_i32_1 = arith.constant 0 : i32
    return %c0_i32, %c0_i32_0 : i32, i32
  }
  func.func @transform_2(%arg0: i32) -> (i32, i32) {
    %c0_i32 = arith.constant 0 : i32
    %c0_i32_0 = arith.constant 0 : i32
    %c0_i32_1 = arith.constant 0 : i32
    return %c0_i32, %c0_i32_0 : i32, i32
  }
  func.func @transform_3(%arg0: i32) -> (i32, i32) {
    %c0_i32 = arith.constant 0 : i32
    %c0_i32_0 = arith.constant 0 : i32
    %c0_i32_1 = arith.constant 0 : i32
    return %c0_i32, %c0_i32_0 : i32, i32
  }
  func.func @transform_4(%arg0: i32) -> (i32, i32) {
    %c0_i32 = arith.constant 0 : i32
    %c0_i32_0 = arith.constant 0 : i32
    %c0_i32_1 = arith.constant 0 : i32
    return %c0_i32, %c0_i32_0 : i32, i32
  }
  func.func @transform_5(%arg0: i32) -> (i32, i32) {
    %c0_i32 = arith.constant 0 : i32
    %c0_i32_0 = arith.constant 0 : i32
    %c0_i32_1 = arith.constant 0 : i32
    return %c0_i32, %c0_i32_0 : i32, i32
  }
  func.func @transform_6(%arg0: i32) -> (i32, i32) {
    %c0_i32 = arith.constant 0 : i32
    %c0_i32_0 = arith.constant 0 : i32
    %c0_i32_1 = arith.constant 0 : i32
    return %c0_i32, %c0_i32_0 : i32, i32
  }
  func.func @transform_7(%arg0: i32) -> (i32, i32) {
    %c0_i32 = arith.constant 0 : i32
    %c0_i32_0 = arith.constant 0 : i32
    return %arg0, %c0_i32 : i32, i32
  }
}

</mosaic_0001>

<bundles_post_ra>
// kernel: tpu_custom_call.1
= control target key start
LH: loop header
LB: loop body
LE: loop exit
PB: predicated region body
PF: predicated region fallthrough
CT: control target
= control target key end

     0   :  { %s1168_s0 = inlined_call_operand.hbm [shape: bf16[24,32], index: 0, kind: input, shape index: {}]   ;;  %s1169_s1 = inlined_call_operand.hbm [shape: bf16[32,64], index: 1, kind: input, shape index: {}]   ;;  %s1170_s2 = inlined_call_operand.vmem [shape: f32[1,64], index: 2, kind: input, shape index: {}]   ;;  %s1171_s3 = inlined_call_operand.hbm [shape: bf16[64,64], index: 3, kind: input, shape index: {}]   ;;  %s1172_s4 = inlined_call_operand.vmem [shape: f32[1,64], index: 4, kind: input, shape index: {}]   ;;  %s1173_s5 = inlined_call_operand.hbm [shape: bf16[64,128], index: 5, kind: input, shape index: {}]   ;;  %s1174_s6 = inlined_call_operand.vmem [shape: f32[1,128], index: 6, kind: input, shape index: {}]   ;;  %s1175_s7 = inlined_call_operand.hbm [shape: f32[24,128], index: 7, kind: output, shape index: {}]  }
   0x1   :  { %1176 = sst [smem:[#allocation15_spill]] %s1169_s1 }
   0x2   :  { %12 = vsyncpa [#allocation3], 0 }
   0x3   :  { %14 = vsyncpa [#allocation3 + $0x1], 0 }
   0x4   :  { %15 = vsyncpa [#allocation6], 0 }
   0x5   :  { %16 = vsyncpa [#allocation9], 0 }
   0x6   :  { %17 = vsyncpa [#allocation4], 0 }
   0x7   :  { %19 = vsyncpa [#allocation4 + $0x1], 0  ;;  %s1004_s24 = smov 0   ;;  %s1006_s25 = smov 0  }
   0x8   :  { %s1008_s26 = smov 0   ;;  %s1010_s27 = smov 0  }
   0x9 LB: > { %s1177_s1 = sld [smem:[#allocation15_spill]]  ;;  %s1028_s8 = sadd.s32 4294967295, %s957_s27   ;;  %s957_s27 = sphi %s1010_s27, %s1187_s27   ;;  %s953_s26 = sphi %s1008_s26, %s1186_s26   ;;  %s949_s25 = sphi %s1006_s25, %s1185_s25   ;;  %s945_s24 = sphi %s1004_s24, %s1184_s24  }
   0xa   : > { %p611_p0 = scmp.ge.s32.totalorder %s957_s27, 1  ;;  %p46_p1 = scmp.eq.s32.totalorder %s1028_s8, 0 }
   0xb   : > { %p208_p2 = scmp.lt.s32.totalorder %s957_s27, 4  ;;  %s959_s10 = smov [#allocation5]  }
   0xc   : > { %s221_s11 = sshll.u32 %s959_s10, 4  ;;  %s236_s14 = sshll.u32 %s1171_s3, 4  ;;  %s222_s11 = int_to_ptr.vmem [resolvable:$true] %s221_s11  ;;  %s237_s14 = int_to_ptr.hbm [resolvable:$true] %s236_s14 }
   0xd   : > { %p1033_p3 = pnand %p611_p0, %p208_p2  ;;  %s253_s18 = sshll.u32 %s1173_s5, 4  ;;  %s254_s18 = int_to_ptr.hbm [resolvable:$true] %s253_s18 }
   0xe   : > { %s960_s19 = smov [#allocation7]   ;;  %s961_s21 = smov 64  }
   0xf   : > { %s219_s30 = sshll.u32 %s1177_s1, 4  ;;  %p697_p4 = pneg %p1033_p3  ;;  %s220_s30 = int_to_ptr.hbm [resolvable:$true] %s219_s30 }
  0x10   : > { %s238_s20 = sshll.u32 %s960_s19, 4  ;;  %s962_s22 = smov 4   ;;  %s239_s20 = int_to_ptr.vmem [resolvable:$true] %s238_s20 }
  0x11   : > { %p1044_p5 = pnand %p697_p4, %p46_p1  ;;  %s963_s23 = smov [#allocation8]  }
  0x12   : > { %s255_s28 = sshll.u32 %s963_s23, 4  ;;  %s610_s29 = sadd.s32 4294967294, %s957_s27   ;;  %s256_s28 = int_to_ptr.vmem [resolvable:$true] %s255_s28 }
  0x13   : > { %700 = dma.hbm_to_vmem [thread:$0]  (!%p1044_p5), %s220_s30, 256, %s222_s11, [#allocation6], %s961_s21, %s961_s21, %s962_s22  }
  0x14   : > { %703 = dma.hbm_to_vmem [thread:$0]  (!%p1044_p5), %s237_s14, 512, %s239_s20, [#allocation6], %s961_s21, %s961_s21, %s962_s22  }
  0x15   : > { %706 = dma.hbm_to_vmem [thread:$0]  (!%p1044_p5), %s254_s18, 512, %s256_s28, [#allocation9], %s961_s21, %s961_s21, %s962_s22  }
  0x16   : > { %s1059_s10 = sadd.s32 1, %s957_s27   ;;  %s32_s12 = sadd.s32 1, %s953_s26 }
  0x17   : > { %s29_s30 = ssub.s32 %s957_s27, %s1059_s10  ;;  %p39_p6 = scmp.ne.s32.totalorder %s953_s26, %s949_s25 }
  0x18   : > { %p30_p7 = scmp.eq.s32.totalorder %s29_s30, 0  ;;  %p40_p8 = scmp.eq.s32.totalorder %s957_s27, 0 }
  0x19   : > { %p45_p9 = scmp.ne.s32.totalorder %s949_s25, %s945_s24  ;;  %p195_p10 = scmp.eq.s32.totalorder %s1028_s8, 2 }
  0x1a   : > { %s1071_s11 = scalar_select %p30_p7, %s953_s26, %s32_s12  }
  0x1b   : > { %p1075_p11 = por %p46_p1, %p45_p9  ;;  %p1079_p12 = por %p195_p10, %p39_p6 }
  0x1c   : > { %p201_p13 = scmp.eq.s32.totalorder %s610_s29, 2  ;;  %p41_p0 = por %p40_p8, %p39_p6 }
  0x1d   : > { %s272_s15 = sand.u32 1, %s953_s26   ;;  %p718_p4 = scmp.lt.s32.totalorder %s957_s27, 3 }
  0x1e   : > { %p1084_p2 = por %p201_p13, %p45_p9  ;;  %s616_s17 = sshll.u32 %s272_s15, 2 }
  0x1f   : > { %s617_s18 = sshll.u32 %s957_s27, 2  ;;  %s276_s23 = scalar_lea.vmem [#allocation2], %s616_s17 }
  0x20   : > { %s280_s21 = scalar_lea.hbm %s1168_s0, %s617_s18  ;;  %s284_s28 = sshll.u32 %s276_s23, 4  ;;  %s285_s28 = int_to_ptr.vmem [resolvable:$true] %s284_s28 }
  0x21   : > { %s282_s22 = sshll.u32 %s280_s21, 4  ;;  %p1093_p5 = pnand %p718_p4, %p41_p0  ;;  %s283_s22 = int_to_ptr.hbm [resolvable:$true] %s282_s22 }
  0x22   : > { %s273_s12 = scalar_lea.sflag [#allocation3], %s272_s15  ;;  %s853_s30 = sshra.s32 %s283_s22, 4  ;;  %s854_s30 = int_to_ptr.hbm [resolvable:$true] %s853_s30 }
  0x23   : > { %s855_s1 = scalar_lea.hbm %s854_s30, 4  ;;  %p857_p7 = pneg %p1093_p5 }
  0x24   : > { %p856_p6 = scmp.ne.s32.totalorder %s854_s30, %s855_s1  ;;  %s860_s17 = scalar_lea.hbm %s1168_s0, 12 }
  0x25   : > { %p861_p10 = scmp.lt.s32.totalorder %s854_s30, %s1168_s0  ;;  %p862_p13 = scmp.lt.s32.totalorder %s860_s17, %s855_s1 }
  0x26   : > { %p858_p8 = pnand %p857_p7, %p856_p6 }
  0x27   : > { %p863_p0 = por %p862_p13, %p861_p10 }
  0x28   : > { %p859_p9 = pneg %p858_p8 }
  0x2a   : > { %p864_p4 = pnand %p863_p0, %p859_p9 }
  0x2c   : > { %867 = shalt.err (!%p864_p4)
}
  0x2d   : > { %710 = dma.hbm_to_vmem [thread:$0]  (!%p1093_p5), %s283_s22, 64, %s285_s28, %s273_s12  }
  0x2e   : > { %293 = sbr.rel (%p1033_p3) target bundleno = 468 (0x1d4), region = 48  ;;  %s1110_s15 = sand.u32 (!%p1033_p3), 1, %s949_s25  }
  0x2f   : > { %s619_s23 = sshll.u32 (!%p1033_p3), %s1110_s15, 2  ;;  %s296_s18 = scalar_lea.sflag (!%p1033_p3), [#allocation3], %s1110_s15 }
  0x30   : > { %s299_s19 = scalar_lea.vmem (!%p1033_p3), [#allocation2], %s619_s23 }
  0x33   : > { %928 = dma.done.wait (%p1075_p11), %s296_s18, 64  }
  0x34   : > { %930 = vsyncadd (%p1075_p11), %s296_s18, 4294967232 }
  0x35   : > { %932 = dma.done.wait (%p46_p1), [#allocation6], 768  }
  0x36   : > { %934 = vsyncadd (%p46_p1), [#allocation6], 4294966528 }
  0x37   : > { %936 = dma.done.wait (%p46_p1), [#allocation9], 512  }
  0x38   : > { %938 = vsyncadd (%p46_p1), [#allocation9], 4294966784  ;;  %v672_v0 = vld [vmem:[#allocation5 + $0x8] sm:$0xff]  ;;  %v671_v2 = vld [vmem:[#allocation5] sm:$0xff]  ;;  %vm368_vm0 = vcmask 261120   ;;  %vm423_vm1 = vcmask 523264  }
  0x39   : > { %v676_v1 = vld [vmem:[#allocation7 + $0x18] sm:$0xff]  ;;  %378 = vmatpush.bf16.msra.mxu0 %v672_v0  ;;  %v675_v3 = vld [vmem:[#allocation7 + $0x10] sm:$0xff]  ;;  %v347_v4 = vld [vmem:[%s299_s19] sm:$0xf]  ;;  %s668_s28 = sshll.u32 %s1028_s8, 3  ;;  %s623_s29 = sshll.u32 %s1110_s15, 3 }
  0x3a   : > { %431 = vmatpush.bf16.msra.mxu1 %v676_v1  ;;  %v674_v5 = vld [vmem:[#allocation7 + $0x8] sm:$0xff]  ;;  %v673_v6 = vld [vmem:[#allocation7] sm:$0xff]  ;;  %v680_v7 = vld [vmem:[#allocation8 + $0x18] sm:$0xff]  ;;  %s506_s17 = scalar_lea.hbm %s1175_s7, %s668_s28  ;;  %s345_s23 = scalar_lea.vmem [#allocation10], %s623_s29 }
  0x3b   : > { %485 = vmatpush.bf16.msra.mxu2 %v680_v7  ;;  %v679_v8 = vld [vmem:[#allocation8 + $0x10] sm:$0xff]  ;;  %v760_v9 = vld [vmem:[%s1170_s2] ss:$0 sm:$0xff]  ;;  %v677_v16 = vld [vmem:[#allocation8] sm:$0xff]  ;;  %s508_s18 = sshll.u32 %s345_s23, 4  ;;  %s510_s19 = sshll.u32 %s506_s17, 4  ;;  %s509_s18 = int_to_ptr.vmem [resolvable:$true] %s508_s18  ;;  %s511_s19 = int_to_ptr.hbm [resolvable:$true] %s510_s19 }
  0x3c   : > { %v678_v15 = vld [vmem:[#allocation8 + $0x8] sm:$0xff]  ;;  %s496_s1 = scalar_lea.sflag [#allocation4], %s1110_s15  ;;  %s897_s8 = sshra.s32 %s511_s19, 4  ;;  %s898_s8 = int_to_ptr.hbm [resolvable:$true] %s897_s8 }
  0x3d   : > { %379 = vmatpush.bf16.msra.mxu0 %v671_v2  ;;  %v761_v17 = vld [vmem:[%s1172_s4] ss:$0 sm:$0xff]  ;;  %s899_s9 = scalar_lea.hbm %s898_s8, 8  ;;  %s903_s28 = scalar_lea.hbm %s1175_s7, 24 }
  0x3e   : > { %432 = vmatpush.bf16.msra.mxu1 %v675_v3  ;;  %v762_v23 = vld [vmem:[%s1174_s6] ss:$0 sm:$0xff]  ;;  %p900_p1 = scmp.ne.s32.totalorder %s898_s8, %s899_s9  ;;  %p904_p5 = scmp.lt.s32.totalorder %s898_s8, %s1175_s7 }
  0x3f   : > { %486 = vmatpush.bf16.msra.mxu2 %v679_v8  ;;  %p905_p6 = scmp.lt.s32.totalorder %s903_s28, %s899_s9 }
  0x40   : > { %632 = vmatmul.msk.bf16.vlgmr.msra.gmra.mxu0 %vm368_vm0, %v347_v4  ;;  %p901_p3 = pnand %p900_p1, %p1079_p12 }
  0x41   : > { %p906_p7 = por %p905_p6, %p904_p5 }
  0x42   : > { %433 = vmatpush.bf16.msra.mxu1 %v674_v5  ;;  %p902_p11 = pneg %p901_p3 }
  0x43   : > { %487 = vmatpush.bf16.msra.mxu2 %v678_v15 }
  0x44   : > { %p907_p8 = pnand %p906_p7, %p902_p11 }
  0x46   : > { %434 = vmatpush.bf16.msra.mxu1 %v673_v6 }
  0x47   : > { %488 = vmatpush.bf16.msra.mxu2 %v677_v16 }
  0xbd   : > { %v381_v10 = vpop.f32.mrf.mxu0 }
  0xbe   : > { %v382_v11 = vadd.f32 %v760_v9, %v381_v10 }
  0xc0   : > { %v385_v12 = vmax.f32 %v382_v11, 0.0 }
  0xc2   : > { %v386_v13 = vpack.c.bf16 %v385_v12, %v385_v12 }
  0xc4   : > { %649 = vmatmul.msk.bf16.vlgmr.msra.gmra.mxu1 %vm423_vm1, %v386_v13 }
  0xc5   : > { %v383_v14 = vpop.f32.mrf.mxu0 }
 0x141   : > { %v436_v18 = vpop.f32.mrf.mxu1 }
 0x142   : > { %v437_v19 = vadd.f32 %v761_v17, %v436_v18 }
 0x144   : > { %v440_v20 = vmax.f32 %v437_v19, 0.0 }
 0x146   : > { %v441_v21 = vpack.c.bf16 %v440_v20, %v440_v20 }
 0x148   : > { %666 = vmatmul.msk.bf16.vlgmr.msra.gmra.mxu2 %vm423_vm1, %v441_v21 }
 0x149   : > { %v438_v22 = vpop.f32.mrf.mxu1 }
 0x1cb   : > { %v490_v24 = vpop.f32.mrf.mxu2 }
 0x1cc   : > { %v491_v25 = vadd.f32 %v762_v23, %v490_v24 }
 0x1ce   : > { %494 = vst [vmem:[%s345_s23] sm:$0xff] %v491_v25 }
 0x1cf   : > { %910 = shalt.err (!%p907_p8)
}
 0x1d0   : > { %695 = dma.vmem_to_hbm [thread:$0]  (%p1079_p12), %s509_s18, 128, %s511_s19, %s496_s1  }
 0x1d3   : > { %v492_v26 = vpop.f32.mrf.mxu2 }
 0x1d4 PF: > { %p722_p9 = scmp.ge.s32.totalorder %s957_s27, 2  ;;  %s522_s15 = sand.u32 1, %s945_s24  }
 0x1d5   : > { %s523_s30 = scalar_lea.sflag [#allocation4], %s522_s15 }
 0x1d6   : > { %p712_p10 = pnand %p722_p9, %p1084_p2 }
 0x1d8   : > { %p713_p13 = pneg %p712_p10 }
 0x1da   : > { %940 = dma.done.wait (%p713_p13), %s523_s30, 128  }
 0x1db   : > { %942 = vsyncadd (%p713_p13), %s523_s30, 4294967168  ;;  %p22_p0 = scmp.ge.s32.totalorder %s1059_s10, 5   ;;  %s1184_s24 = smov %s949_s25 }
 0x1dc   : > { %s1185_s25 = smov %s953_s26  ;;  %s1186_s26 = smov %s1071_s11 }
 0x1dd   : > { %s1187_s27 = smov %s1059_s10  ;;  %24 = sbr.rel (!%p22_p0) target bundleno = 9 (0x9), region = 105 }
 0x1e2   :  { %529 = vsyncpa [#allocation3], 1 }
 0x1e3   :  { %531 = vsyncpa [#allocation3 + $0x1], 1 }
 0x1e4   :  { %532 = vsyncpa [#allocation6], 1 }
 0x1e5   :  { %533 = vsyncpa [#allocation9], 1 }
 0x1e6   :  { %534 = vsyncpa [#allocation4], 1 }
 0x1e7   :  { %536 = vsyncpa [#allocation4 + $0x1], 1 }

</bundles_post_ra>
